<compile_context>
chip_gen: v6e
topology: v6e:2x2x1
jax: 0.10.0
libtpu: 0.0.40
codegen_flags: <defaults>
</compile_context>

<pallas_src>
import jax
import jax.numpy as jnp
from jax.experimental import pallas as pl
from jax.experimental.pallas import tpu as pltpu


def _round_up(v, m):
    return ((v + m - 1) // m) * m


def _vmem_capacity_bytes():
    """Generation-aware VMEM capacity (128 MiB v5e/v6e, 64 MiB per core on v7x)."""
    try:
        return int(pltpu.get_tpu_info().vmem_capacity_bytes)
    except Exception:
        return 64 << 20  # conservative fallback (v7x per-core)


def concat_fusion_kernel(x_ref, y_ref, wxo_ref, wyo_ref, b_ref, out_ref):
    tn = wxo_ref.shape[-1] // 2  # per-output lane width of this N tile

    # Two wide MXU matmuls per tile: columns [:tn] are the fc_x / fc_y weights,
    # columns [tn:] are the corresponding half of fc_out's weight.
    # bf16 inputs + f32 accumulation when compute_dtype is bf16.
    xr = jnp.dot(x_ref[...], wxo_ref[...], preferred_element_type=jnp.float32)
    yr = jnp.dot(y_ref[...], wyo_ref[...], preferred_element_type=jnp.float32)

    # One lane-dense (TM, 3*tn) output slab: [out_x | out_y | out].
    # All slice boundaries are multiples of 128 lanes -> unmasked stores.
    out_ref[:, :tn] = (xr[:, :tn] + b_ref[:, :tn]).astype(out_ref.dtype)
    out_ref[:, tn:2 * tn] = (yr[:, :tn] + b_ref[:, tn:2 * tn]).astype(out_ref.dtype)
    out_ref[:, 2 * tn:] = (
        xr[:, tn:] + yr[:, tn:] + b_ref[:, 2 * tn:]
    ).astype(out_ref.dtype)


def pack_concat_fusion_params(params, *, compute_dtype=jnp.bfloat16, tn=None):
    """Pad + pack the weights ONCE (outside jit) into the kernel layout.

    params: wx/wy/wo_x/wo_y of shape (D, O) (already transposed from torch's
    (O, D)), and bx/by/bo of shape (1, O).
    Returns a dict of device arrays plus static meta consumed by concat_fusion().
    """
    D, O = params["wx"].shape
    Dp = _round_up(D, 128)
    act_bytes = jnp.dtype(compute_dtype).itemsize
    budget = _vmem_capacity_bytes() - (8 << 20)  # headroom for compiler scratch

    if tn is None:
        Op_full = _round_up(O, 128)
        # Resident single-buffered weights: 2 * (Dp x 2*Op). Keep them under
        # ~60% of VMEM so the batch tiles / output slab still fit.
        if 2 * Dp * 2 * Op_full * act_bytes <= 0.6 * budget:
            tn = Op_full
        else:
            tn = 512  # N-tiling fallback: 512-lane output chunks
    tn = max(128, _round_up(tn, 128))

    Op = _round_up(O, tn)
    grid_n = Op // tn

    f32 = jnp.float32
    pad_w = lambda w: jnp.pad(w.astype(f32), ((0, Dp - D), (0, Op - O)))
    pad_b = lambda b: jnp.pad(b.astype(f32), ((0, 0), (0, Op - O)))

    # Per-N-tile interleave so a (Dp, 2*tn) block j is [Wfc_j | Wout_j].
    def pack_w(w_fc, w_out):
        a = pad_w(w_fc).reshape(Dp, grid_n, 1, tn)
        b = pad_w(w_out).reshape(Dp, grid_n, 1, tn)
        return jnp.concatenate([a, b], axis=2).reshape(
            Dp, grid_n * 2 * tn).astype(compute_dtype)

    wxo = pack_w(params["wx"], params["wo_x"])
    wyo = pack_w(params["wy"], params["wo_y"])

    # Bias tile j is [bx_j | by_j | bo_j]; kept in f32 (added after the MXU).
    bias = jnp.concatenate(
        [pad_b(params["bx"]).reshape(1, grid_n, 1, tn),
         pad_b(params["by"]).reshape(1, grid_n, 1, tn),
         pad_b(params["bo"]).reshape(1, grid_n, 1, tn)],
        axis=2).reshape(1, grid_n * 3 * tn)

    return {
        "wxo": wxo, "wyo": wyo, "bias": bias,
        "D": D, "O": O, "Dp": Dp, "Op": Op, "TN": tn, "grid_n": grid_n,
        "compute_dtype": compute_dtype,
    }


def concat_fusion(x, y, packed, *, tm=512):
    """x, y: (B, D). Returns (out_x, out_y, out), each (B, O) float32."""
    B, D = x.shape
    assert D == packed["D"], "input dim mismatch with packed params"
    O, Dp, Op = packed["O"], packed["Dp"], packed["Op"]
    TN, grid_n = packed["TN"], packed["grid_n"]
    cdt = packed["compute_dtype"]
    act_bytes = jnp.dtype(cdt).itemsize

    # Batch tile: multiple of 16 (bf16 sublane packing); large default to
    # amortize the ~0.35us per-grid-step overhead.
    TM = max(16, min(_round_up(tm, 16), _round_up(B, 16)))
    Bp = _round_up(B, TM)
    grid_m = Bp // TM

    pad_in = lambda a: jnp.pad(a.astype(cdt), ((0, Bp - B), (0, Dp - D)))
    xp, yp = pad_in(x), pad_in(y)

    row_spec = pl.BlockSpec((TM, Dp), lambda i, j: (i, 0))
    out_spec = pl.BlockSpec((TM, 3 * TN), lambda i, j: (i, j))

    # Resident case (grid_n == 1): constant index_map + single buffer so the
    # pipeliner doesn't allocate 2 copies of the weights (matters on v7x 64 MiB).
    # Tiled case: weights change per step, keep default double-buffering.
    def _resident_spec(shape):
        if grid_n == 1:
            try:
                return pl.BlockSpec(shape, lambda i, j: (0, j),
                                    pipeline_mode=pl.Buffered(1))
            except TypeError:
                pass  # older jax without pipeline_mode; default buffering
        return pl.BlockSpec(shape, lambda i, j: (0, j))

    w_spec = _resident_spec((Dp, 2 * TN))
    b_spec = _resident_spec((1, 3 * TN))

    wbuf = 1 if grid_n == 1 else 2
    vmem_need = (2 * Dp * (2 * TN) * act_bytes * wbuf     # wxo, wyo
                 + (3 * TN) * 4 * wbuf                    # bias
                 + 2 * 2 * TM * Dp * act_bytes            # x, y tiles (double-buffered)
                 + 2 * TM * (3 * TN) * 4)                 # output slab (double-buffered)
    budget = _vmem_capacity_bytes() - (8 << 20)
    vmem_limit = max(16 << 20, min(int(vmem_need * 1.25) + (1 << 20), budget))

    cost = pl.CostEstimate(
        flops=2 * 2 * Bp * Dp * (2 * Op),   # two (Bp,Dp)x(Dp,2*Op) matmuls
        transcendentals=0,
        bytes_accessed=(2 * Bp * Dp * act_bytes * grid_n
                        + 2 * Dp * 2 * Op * act_bytes * (grid_m if grid_n > 1 else 1)
                        + 3 * Bp * Op * 4),
    )

    out_slab = pl.pallas_call(
        concat_fusion_kernel,
        out_shape=jax.ShapeDtypeStruct((Bp, grid_n * 3 * TN), jnp.float32),
        grid=(grid_m, grid_n),
        in_specs=[row_spec, row_spec, w_spec, w_spec, b_spec],
        out_specs=out_spec,
        compiler_params=pltpu.CompilerParams(
            # Batch axis is megacore-shardable.
            # TODO(synk): on v7x with grid_m >= 2, benchmark pltpu.CORE_PARALLEL here.
            dimension_semantics=("parallel", "arbitrary"),
            vmem_limit_bytes=vmem_limit,
        ),
        cost_estimate=cost,
    )(xp, yp, packed["wxo"], packed["wyo"], packed["bias"])

    # Un-interleave the per-tile [out_x | out_y | out] slab and strip padding.
    slab = out_slab.reshape(Bp, grid_n, 3, TN)
    out_x = slab[:, :, 0, :].reshape(Bp, Op)[:B, :O]
    out_y = slab[:, :, 1, :].reshape(Bp, Op)[:B, :O]
    out = slab[:, :, 2, :].reshape(Bp, Op)[:B, :O]
    return out_x, out_y, out


def init_params(key, input_dim, output_dim):
    """Deterministic init mimicking nn.Linear default (uniform +/- 1/sqrt(fan_in))."""
    k = jax.random.split(key, 6)

    def uni(k_, shape, fan_in):
        bound = 1.0 / jnp.sqrt(fan_in)
        return jax.random.uniform(k_, shape, jnp.float32, -bound, bound)

    # fc_x / fc_y: torch weight is (O, D); store transposed (D, O).
    wx = uni(k[0], (input_dim, output_dim), input_dim)
    bx = uni(k[1], (1, output_dim), input_dim)
    wy = uni(k[2], (input_dim, output_dim), input_dim)
    by = uni(k[3], (1, output_dim), input_dim)
    # fc_out: torch weight is (O, 2D); store transposed and split into two (D, O).
    wo = uni(k[4], (2 * input_dim, output_dim), 2 * input_dim)
    bo = uni(k[5], (1, output_dim), 2 * input_dim)

    return {
        "wx": wx, "bx": bx,
        "wy": wy, "by": by,
        "wo_x": wo[:input_dim], "wo_y": wo[input_dim:], "bo": bo,
    }


def reference(x, y, params):
    out_x = x @ params["wx"] + params["bx"]
    out_y = y @ params["wy"] + params["by"]
    cat = jnp.concatenate([x, y], axis=1)
    wo_full = jnp.concatenate([params["wo_x"], params["wo_y"]], axis=0)
    out = cat @ wo_full + params["bo"]
    return out_x, out_y, out


if __name__ == "__main__":
    key = jax.random.PRNGKey(0)

    def run_case(batch, input_dim, output_dim, compute_dtype, tn, tm, atol, rtol):
        kx, ky, kp = jax.random.split(jax.random.fold_in(key, output_dim), 3)
        x = jax.random.normal(kx, (batch, input_dim), jnp.float32)
        y = jax.random.normal(ky, (batch, input_dim), jnp.float32)
        params = init_params(kp, input_dim, output_dim)

        packed = pack_concat_fusion_params(
            params, compute_dtype=compute_dtype, tn=tn)
        fused = jax.jit(lambda a, b: concat_fusion(a, b, packed, tm=tm))
        out_x, out_y, out = fused(x, y)
        jax.block_until_ready((out_x, out_y, out))

        ref_x, ref_y, ref_out = reference(x, y, params)
        assert out_x.shape == (batch, output_dim)
        assert out_y.shape == (batch, output_dim)
        assert out.shape == (batch, output_dim)
        assert jnp.allclose(out_x, ref_x, atol=atol, rtol=rtol), "out_x mismatch"
        assert jnp.allclose(out_y, ref_y, atol=atol, rtol=rtol), "out_y mismatch"
        assert jnp.allclose(out, ref_out, atol=atol, rtol=rtol), "out mismatch"

    # f32 compute path, resident weights (grid_n == 1): tight parity with reference.
    run_case(batch=16, input_dim=128, output_dim=100,
             compute_dtype=jnp.float32, tn=None, tm=512, atol=1e-4, rtol=1e-4)

    # bf16 MXU path (default): ~2x MXU throughput on v6e/v7x, looser tolerance.
    run_case(batch=16, input_dim=128, output_dim=100,
             compute_dtype=jnp.bfloat16, tn=None, tm=512, atol=2e-2, rtol=2e-2)

    # Forced N-tiling fallback + multi-step batch grid (exercises grid=(3, 3)).
    run_case(batch=40, input_dim=128, output_dim=300,
             compute_dtype=jnp.bfloat16, tn=128, tm=16, atol=2e-2, rtol=2e-2)

    print("KERNEL_OK")
</pallas_src>

<mosaic_0001>
module attributes {stable_mosaic.version = 11 : i64} {
  func.func @concat_fusion_kernel(%arg0: i32, %arg1: i32, %arg2: memref<16x128xf32, #tpu.memory_space<vmem>>, %arg3: memref<16x128xf32, #tpu.memory_space<vmem>>, %arg4: memref<128x256xf32, #tpu.memory_space<vmem>>, %arg5: memref<128x256xf32, #tpu.memory_space<vmem>>, %arg6: memref<1x384xf32, #tpu.memory_space<vmem>>, %arg7: memref<16x384xf32, #tpu.memory_space<vmem>>) attributes {dimension_semantics = [#tpu.dimension_semantics<parallel>, #tpu.dimension_semantics<arbitrary>], iteration_bounds = array<i64: 1, 1>, scalar_prefetch = 0 : i64, scratch_operands = 0 : i64, tpu.core_type = #tpu.core_type<tc>, window_params = [{transform_indices = @transform_0, window_bounds = array<i64: 16, 128>}, {transform_indices = @transform_1, window_bounds = array<i64: 16, 128>}, {pipeline_mode = #tpu.pipeline_mode<synchronous>, transform_indices = @transform_2, window_bounds = array<i64: 128, 256>}, {pipeline_mode = #tpu.pipeline_mode<synchronous>, transform_indices = @transform_3, window_bounds = array<i64: 128, 256>}, {pipeline_mode = #tpu.pipeline_mode<synchronous>, transform_indices = @transform_4, window_bounds = array<i64: 1, 384>}, {transform_indices = @transform_5, window_bounds = array<i64: 16, 384>}]} {
    %c0 = arith.constant 0 : index
    %c0_0 = arith.constant 0 : index
    %0 = vector.load %arg2[%c0, %c0_0] : memref<16x128xf32, #tpu.memory_space<vmem>>, vector<16x128xf32>
    %c0_1 = arith.constant 0 : index
    %c0_2 = arith.constant 0 : index
    %1 = vector.load %arg4[%c0_1, %c0_2] : memref<128x256xf32, #tpu.memory_space<vmem>>, vector<128x256xf32>
    %cst = arith.constant dense<0.000000e+00> : vector<16x256xf32>
    %2 = tpu.matmul %0, %1, %cst {dimension_numbers = #tpu.dot_dimension_numbers<[1], [0], [0], [1], [0, 0, 1, 1], [], []>} : vector<16x128xf32>, vector<128x256xf32>, vector<16x256xf32> -> vector<16x256xf32>
    %c0_3 = arith.constant 0 : index
    %c0_4 = arith.constant 0 : index
    %3 = vector.load %arg3[%c0_3, %c0_4] : memref<16x128xf32, #tpu.memory_space<vmem>>, vector<16x128xf32>
    %c0_5 = arith.constant 0 : index
    %c0_6 = arith.constant 0 : index
    %4 = vector.load %arg5[%c0_5, %c0_6] : memref<128x256xf32, #tpu.memory_space<vmem>>, vector<128x256xf32>
    %cst_7 = arith.constant dense<0.000000e+00> : vector<16x256xf32>
    %5 = tpu.matmul %3, %4, %cst_7 {dimension_numbers = #tpu.dot_dimension_numbers<[1], [0], [0], [1], [0, 0, 1, 1], [], []>} : vector<16x128xf32>, vector<128x256xf32>, vector<16x256xf32> -> vector<16x256xf32>
    %6 = vector.extract_strided_slice %2 {offsets = [0, 0], sizes = [16, 128], strides = [1, 1]} : vector<16x256xf32> to vector<16x128xf32>
    %c0_8 = arith.constant 0 : index
    %c0_9 = arith.constant 0 : index
    %7 = vector.load %arg6[%c0_8, %c0_9] : memref<1x384xf32, #tpu.memory_space<vmem>>, vector<1x128xf32>
    %8 = vector.broadcast %7 : vector<1x128xf32> to vector<16x128xf32>
    %9 = arith.addf %6, %8 : vector<16x128xf32>
    %c0_10 = arith.constant 0 : index
    %c0_11 = arith.constant 0 : index
    %10 = vector.load %arg7[%c0_10, %c0_11] : memref<16x384xf32, #tpu.memory_space<vmem>>, vector<16x128xf32>
    tpu.vector_store %arg7[%c0_10, %c0_11], %9 {strides = array<i32>} : memref<16x384xf32, #tpu.memory_space<vmem>>, vector<16x128xf32>,
    %11 = vector.extract_strided_slice %5 {offsets = [0, 0], sizes = [16, 128], strides = [1, 1]} : vector<16x256xf32> to vector<16x128xf32>
    %c0_12 = arith.constant 0 : index
    %c128 = arith.constant 128 : index
    %12 = vector.load %arg6[%c0_12, %c128] : memref<1x384xf32, #tpu.memory_space<vmem>>, vector<1x128xf32>
    %13 = vector.broadcast %12 : vector<1x128xf32> to vector<16x128xf32>
    %14 = arith.addf %11, %13 : vector<16x128xf32>
    %c0_13 = arith.constant 0 : index
    %c128_14 = arith.constant 128 : index
    %15 = vector.load %arg7[%c0_13, %c128_14] : memref<16x384xf32, #tpu.memory_space<vmem>>, vector<16x128xf32>
    tpu.vector_store %arg7[%c0_13, %c128_14], %14 {strides = array<i32>} : memref<16x384xf32, #tpu.memory_space<vmem>>, vector<16x128xf32>,
    %16 = vector.extract_strided_slice %2 {offsets = [0, 128], sizes = [16, 128], strides = [1, 1]} : vector<16x256xf32> to vector<16x128xf32>
    %17 = vector.extract_strided_slice %5 {offsets = [0, 128], sizes = [16, 128], strides = [1, 1]} : vector<16x256xf32> to vector<16x128xf32>
    %18 = arith.addf %16, %17 : vector<16x128xf32>
    %c0_15 = arith.constant 0 : index
    %c256 = arith.constant 256 : index
    %19 = vector.load %arg6[%c0_15, %c256] : memref<1x384xf32, #tpu.memory_space<vmem>>, vector<1x128xf32>
    %20 = vector.broadcast %19 : vector<1x128xf32> to vector<16x128xf32>
    %21 = arith.addf %18, %20 : vector<16x128xf32>
    %c0_16 = arith.constant 0 : index
    %c256_17 = arith.constant 256 : index
    %22 = vector.load %arg7[%c0_16, %c256_17] : memref<16x384xf32, #tpu.memory_space<vmem>>, vector<16x128xf32>
    tpu.vector_store %arg7[%c0_16, %c256_17], %21 {strides = array<i32>} : memref<16x384xf32, #tpu.memory_space<vmem>>, vector<16x128xf32>,
    return
  }
  func.func @transform_0(%arg0: i32, %arg1: i32) -> (i32, i32) {
    %c0_i32 = arith.constant 0 : i32
    %c0_i32_0 = arith.constant 0 : i32
    return %arg0, %c0_i32 : i32, i32
  }
  func.func @transform_1(%arg0: i32, %arg1: i32) -> (i32, i32) {
    %c0_i32 = arith.constant 0 : i32
    %c0_i32_0 = arith.constant 0 : i32
    return %arg0, %c0_i32 : i32, i32
  }
  func.func @transform_2(%arg0: i32, %arg1: i32) -> (i32, i32) {
    %c0_i32 = arith.constant 0 : i32
    %c0_i32_0 = arith.constant 0 : i32
    return %c0_i32, %arg1 : i32, i32
  }
  func.func @transform_3(%arg0: i32, %arg1: i32) -> (i32, i32) {
    %c0_i32 = arith.constant 0 : i32
    %c0_i32_0 = arith.constant 0 : i32
    return %c0_i32, %arg1 : i32, i32
  }
  func.func @transform_4(%arg0: i32, %arg1: i32) -> (i32, i32) {
    %c0_i32 = arith.constant 0 : i32
    %c0_i32_0 = arith.constant 0 : i32
    return %c0_i32, %arg1 : i32, i32
  }
  func.func @transform_5(%arg0: i32, %arg1: i32) -> (i32, i32) {
    %c0_i32 = arith.constant 0 : i32
    return %arg0, %arg1 : i32, i32
  }
}

</mosaic_0001>

<bundles_post_ra>
// kernel: _lambda_.1
= control target key start
LH: loop header
LB: loop body
LE: loop exit
PB: predicated region body
PF: predicated region fallthrough
CT: control target
= control target key end

     0   :  { %10 = vsyncpa [#allocation3], 0  ;;  %s519_s0 = inlined_call_operand.hbm [shape: f32[16,128], index: 0, kind: input, shape index: {}]   ;;  %s520_s1 = inlined_call_operand.hbm [shape: f32[16,128], index: 1, kind: input, shape index: {}]   ;;  %s521_s2 = inlined_call_operand.hbm [shape: f32[128,256], index: 2, kind: input, shape index: {}]   ;;  %s522_s3 = inlined_call_operand.hbm [shape: f32[128,256], index: 3, kind: input, shape index: {}]   ;;  %s523_s4 = inlined_call_operand.vmem [shape: f32[1,384], index: 4, kind: input, shape index: {}]   ;;  %s524_s5 = inlined_call_operand.vmem [shape: f32[16,384], index: 5, kind: output, shape index: {}]  }
   0x1   :  { %11 = vsyncpa [#allocation5], 0 }
   0x2   :  { %12 = vsyncpa [#allocation8], 0  ;;  %s437_s18 = smov [#allocation4]   ;;  %s438_s20 = smov [#allocation2]  }
   0x3   :  { %s30_s19 = sshll.u32 %s437_s18, 4  ;;  %s18_s21 = sshll.u32 %s438_s20, 4  ;;  %s31_s19 = int_to_ptr.vmem [resolvable:$true] %s30_s19  ;;  %s19_s21 = int_to_ptr.vmem [resolvable:$true] %s18_s21 }
   0x4   :  { %s359_s22 = scalar_lea.vmem %s31_s19, 256  ;;  %p364_p1 = scmp.lt.s32.totalorder %s31_s19, %s31_s19 }
   0x5   :  { %p360_p0 = scmp.ne.s32.totalorder %s31_s19, %s359_s22  ;;  %p365_p2 = scmp.lt.s32.totalorder %s359_s22, %s359_s22 }
   0x7   :  { %p366_p3 = por %p365_p2, %p364_p1 }
   0x9   :  { %p367_p4 = pnand %p366_p3, %p360_p0 }
   0xb   :  { %370 = shalt.err (!%p367_p4)
}
   0xc   :  { %s439_s23 = smov 128   ;;  %s440_s24 = smov 8  }
   0xd   :  { %36 = dma.hbm_to_vmem [thread:$0]  %s520_s1, 256, %s31_s19, [#allocation5], %s439_s23, %s439_s23, %s440_s24  }
   0xe   :  { %s379_s27 = scalar_lea.vmem %s19_s21, 256  ;;  %p384_p6 = scmp.lt.s32.totalorder %s19_s21, %s19_s21 }
   0xf   :  { %p380_p5 = scmp.ne.s32.totalorder %s19_s21, %s379_s27  ;;  %p385_p7 = scmp.lt.s32.totalorder %s379_s27, %s379_s27 }
  0x11   :  { %p386_p8 = por %p385_p7, %p384_p6 }
  0x13   :  { %p387_p9 = pnand %p386_p8, %p380_p5 }
  0x15   :  { %390 = shalt.err (!%p387_p9)
}
  0x16   :  { %24 = dma.hbm_to_vmem [thread:$0]  %s519_s0, 256, %s19_s21, [#allocation3], %s439_s23, %s439_s23, %s440_s24  }
  0x17   :  { %s441_s30 = smov [#allocation6]  }
  0x18   :  { %s42_s6 = sshll.u32 %s441_s30, 4  ;;  %s43_s6 = int_to_ptr.vmem [resolvable:$true] %s42_s6 }
  0x19   :  { %s399_s7 = scalar_lea.vmem %s43_s6, 4096  ;;  %p404_p11 = scmp.lt.s32.totalorder %s43_s6, %s43_s6 }
  0x1a   :  { %p400_p10 = scmp.ne.s32.totalorder %s43_s6, %s399_s7  ;;  %p405_p12 = scmp.lt.s32.totalorder %s399_s7, %s399_s7 }
  0x1c   :  { %p406_p13 = por %p405_p12, %p404_p11 }
  0x1e   :  { %p407_p0 = pnand %p406_p13, %p400_p10 }
  0x20   :  { %410 = shalt.err (!%p407_p0)
}
  0x21   :  { %s442_s1 = smov 256   ;;  %s443_s8 = smov 16  }
  0x22   :  { %48 = dma.hbm_to_vmem [thread:$0]  %s521_s2, 4096, %s43_s6, [#allocation5], %s442_s1, %s442_s1, %s443_s8  }
  0x23   :  { %s444_s11 = smov [#allocation7]  }
  0x24   :  { %s54_s12 = sshll.u32 %s444_s11, 4  ;;  %s55_s12 = int_to_ptr.vmem [resolvable:$true] %s54_s12 }
  0x25   :  { %s419_s0 = scalar_lea.vmem %s55_s12, 4096  ;;  %p424_p2 = scmp.lt.s32.totalorder %s55_s12, %s55_s12 }
  0x26   :  { %p420_p1 = scmp.ne.s32.totalorder %s55_s12, %s419_s0  ;;  %p425_p3 = scmp.lt.s32.totalorder %s419_s0, %s419_s0 }
  0x28   :  { %p426_p4 = por %p425_p3, %p424_p2 }
  0x2a   :  { %p427_p5 = pnand %p426_p4, %p420_p1 }
  0x2c   :  { %430 = shalt.err (!%p427_p5)
}
  0x2d   :  { %60 = dma.hbm_to_vmem [thread:$0]  %s522_s3, 4096, %s55_s12, [#allocation8], %s442_s1, %s442_s1, %s443_s8  }
  0x2e   :  { %431 = dma.done.wait [#allocation3], 256  }
  0x2f   :  { %432 = vsyncadd [#allocation3], 4294967040 }
  0x30   :  { %433 = dma.done.wait [#allocation5], 4352  }
  0x31   :  { %434 = vsyncadd [#allocation5], 4294962944 }
  0x32   :  { %435 = dma.done.wait [#allocation8], 4096  }
  0x33   :  { %436 = vsyncadd [#allocation8], 4294963200  ;;  %v445_v0 = vmov 0.0   ;;  %v108_v1 = vld [vmem:[#allocation6 + $0xf8] sm:$0xff]  ;;  %v107_v3 = vld [vmem:[#allocation6 + $0xf0] sm:$0xff] }
  0x34   :  { %173 = vmatprep.mubr.f32.mxu0 %v445_v0  ;;  %284 = vmatprep.mubr.f32.mxu1 %v445_v0  ;;  %v219_v2 = vld [vmem:[#allocation7 + $0xf8] sm:$0xff]  ;;  %v218_v4 = vld [vmem:[#allocation7 + $0xf0] sm:$0xff]  ;;  %v106_v5 = vld [vmem:[#allocation6 + $0xe8] sm:$0xff] }
  0x35   :  { %109 = vmatprep.subr.mxu0 %v108_v1  ;;  %220 = vmatprep.subr.mxu1 %v219_v2  ;;  %v217_v6 = vld [vmem:[#allocation7 + $0xe8] sm:$0xff]  ;;  %v105_v7 = vld [vmem:[#allocation6 + $0xe0] sm:$0xff]  ;;  %v104_v9 = vld [vmem:[#allocation6 + $0xd8] sm:$0xff] }
  0x36   :  { %110 = vmatpush1.msra.mxu0 %v107_v3  ;;  %221 = vmatpush1.msra.mxu1 %v218_v4  ;;  %v216_v8 = vld [vmem:[#allocation7 + $0xe0] sm:$0xff]  ;;  %v215_v10 = vld [vmem:[#allocation7 + $0xd8] sm:$0xff]  ;;  %v103_v11 = vld [vmem:[#allocation6 + $0xd0] sm:$0xff] }
  0x37   :  { %111 = vmatprep.subr.mxu0 %v106_v5  ;;  %222 = vmatprep.subr.mxu1 %v217_v6  ;;  %v214_v12 = vld [vmem:[#allocation7 + $0xd0] sm:$0xff]  ;;  %v102_v13 = vld [vmem:[#allocation6 + $0xc8] sm:$0xff]  ;;  %v101_v15 = vld [vmem:[#allocation6 + $0xc0] sm:$0xff] }
  0x38   :  { %112 = vmatpush1.msra.mxu0 %v105_v7  ;;  %223 = vmatpush1.msra.mxu1 %v216_v8  ;;  %v213_v14 = vld [vmem:[#allocation7 + $0xc8] sm:$0xff]  ;;  %v212_v16 = vld [vmem:[#allocation7 + $0xc0] sm:$0xff]  ;;  %v100_v17 = vld [vmem:[#allocation6 + $0xb8] sm:$0xff] }
  0x39   :  { %113 = vmatprep.subr.mxu0 %v104_v9  ;;  %224 = vmatprep.subr.mxu1 %v215_v10  ;;  %v211_v18 = vld [vmem:[#allocation7 + $0xb8] sm:$0xff]  ;;  %v99_v19 = vld [vmem:[#allocation6 + $0xb0] sm:$0xff]  ;;  %v98_v21 = vld [vmem:[#allocation6 + $0xa8] sm:$0xff] }
  0x3a   :  { %114 = vmatpush1.msra.mxu0 %v103_v11  ;;  %225 = vmatpush1.msra.mxu1 %v214_v12  ;;  %v210_v20 = vld [vmem:[#allocation7 + $0xb0] sm:$0xff]  ;;  %v209_v22 = vld [vmem:[#allocation7 + $0xa8] sm:$0xff]  ;;  %v97_v23 = vld [vmem:[#allocation6 + $0xa0] sm:$0xff] }
  0x3b   :  { %115 = vmatprep.subr.mxu0 %v102_v13  ;;  %226 = vmatprep.subr.mxu1 %v213_v14  ;;  %v208_v24 = vld [vmem:[#allocation7 + $0xa0] sm:$0xff]  ;;  %v96_v25 = vld [vmem:[#allocation6 + $0x98] sm:$0xff]  ;;  %v95_v27 = vld [vmem:[#allocation6 + $0x90] sm:$0xff] }
  0x3c   :  { %116 = vmatpush1.msra.mxu0 %v101_v15  ;;  %227 = vmatpush1.msra.mxu1 %v212_v16  ;;  %v207_v26 = vld [vmem:[#allocation7 + $0x98] sm:$0xff]  ;;  %v206_v28 = vld [vmem:[#allocation7 + $0x90] sm:$0xff]  ;;  %v94_v29 = vld [vmem:[#allocation6 + $0x88] sm:$0xff] }
  0x3d   :  { %117 = vmatprep.subr.mxu0 %v100_v17  ;;  %228 = vmatprep.subr.mxu1 %v211_v18  ;;  %v205_v30 = vld [vmem:[#allocation7 + $0x88] sm:$0xff]  ;;  %v93_v31 = vld [vmem:[#allocation6 + $0x80] sm:$0xff]  ;;  %v92_v33 = vld [vmem:[#allocation6 + $0x78] sm:$0xff] }
  0x3e   :  { %118 = vmatpush1.msra.mxu0 %v99_v19  ;;  %229 = vmatpush1.msra.mxu1 %v210_v20  ;;  %v204_v32 = vld [vmem:[#allocation7 + $0x80] sm:$0xff]  ;;  %v203_v34 = vld [vmem:[#allocation7 + $0x78] sm:$0xff]  ;;  %v91_v35 = vld [vmem:[#allocation6 + $0x70] sm:$0xff] }
  0x3f   :  { %119 = vmatprep.subr.mxu0 %v98_v21  ;;  %230 = vmatprep.subr.mxu1 %v209_v22  ;;  %v202_v36 = vld [vmem:[#allocation7 + $0x70] sm:$0xff]  ;;  %v90_v37 = vld [vmem:[#allocation6 + $0x68] sm:$0xff]  ;;  %v89_v39 = vld [vmem:[#allocation6 + $0x60] sm:$0xff] }
  0x40   :  { %120 = vmatpush1.msra.mxu0 %v97_v23  ;;  %231 = vmatpush1.msra.mxu1 %v208_v24  ;;  %v201_v38 = vld [vmem:[#allocation7 + $0x68] sm:$0xff]  ;;  %v200_v40 = vld [vmem:[#allocation7 + $0x60] sm:$0xff]  ;;  %v88_v41 = vld [vmem:[#allocation6 + $0x58] sm:$0xff] }
  0x41   :  { %121 = vmatprep.subr.mxu0 %v96_v25  ;;  %232 = vmatprep.subr.mxu1 %v207_v26  ;;  %v199_v42 = vld [vmem:[#allocation7 + $0x58] sm:$0xff]  ;;  %v87_v43 = vld [vmem:[#allocation6 + $0x50] sm:$0xff]  ;;  %v86_v45 = vld [vmem:[#allocation6 + $0x48] sm:$0xff] }
  0x42   :  { %122 = vmatpush1.msra.mxu0 %v95_v27  ;;  %233 = vmatpush1.msra.mxu1 %v206_v28  ;;  %v198_v44 = vld [vmem:[#allocation7 + $0x50] sm:$0xff]  ;;  %v197_v46 = vld [vmem:[#allocation7 + $0x48] sm:$0xff]  ;;  %v85_v47 = vld [vmem:[#allocation6 + $0x40] sm:$0xff] }
  0x43   :  { %123 = vmatprep.subr.mxu0 %v94_v29  ;;  %234 = vmatprep.subr.mxu1 %v205_v30  ;;  %v196_v48 = vld [vmem:[#allocation7 + $0x40] sm:$0xff]  ;;  %v84_v49 = vld [vmem:[#allocation6 + $0x38] sm:$0xff]  ;;  %v83_v51 = vld [vmem:[#allocation6 + $0x30] sm:$0xff] }
  0x44   :  { %124 = vmatpush1.msra.mxu0 %v93_v31  ;;  %235 = vmatpush1.msra.mxu1 %v204_v32  ;;  %v195_v50 = vld [vmem:[#allocation7 + $0x38] sm:$0xff]  ;;  %v194_v52 = vld [vmem:[#allocation7 + $0x30] sm:$0xff]  ;;  %v82_v53 = vld [vmem:[#allocation6 + $0x28] sm:$0xff] }
  0x45   :  { %125 = vmatprep.subr.mxu0 %v92_v33  ;;  %236 = vmatprep.subr.mxu1 %v203_v34  ;;  %v193_v54 = vld [vmem:[#allocation7 + $0x28] sm:$0xff]  ;;  %v81_v55 = vld [vmem:[#allocation6 + $0x20] sm:$0xff]  ;;  %v80_v57 = vld [vmem:[#allocation6 + $0x18] sm:$0xff] }
  0x46   :  { %126 = vmatpush1.msra.mxu0 %v91_v35  ;;  %237 = vmatpush1.msra.mxu1 %v202_v36  ;;  %v192_v56 = vld [vmem:[#allocation7 + $0x20] sm:$0xff]  ;;  %v191_v58 = vld [vmem:[#allocation7 + $0x18] sm:$0xff]  ;;  %v79_v59 = vld [vmem:[#allocation6 + $0x10] sm:$0xff] }
  0x47   :  { %127 = vmatprep.subr.mxu0 %v90_v37  ;;  %238 = vmatprep.subr.mxu1 %v201_v38  ;;  %v190_v60 = vld [vmem:[#allocation7 + $0x10] sm:$0xff]  ;;  %v78_v61 = vld [vmem:[#allocation6 + $0x8] sm:$0xff]  ;;  %v77_v63 = vld [vmem:[#allocation6] sm:$0xff] }
  0x48   :  { %128 = vmatpush1.msra.mxu0 %v89_v39  ;;  %239 = vmatpush1.msra.mxu1 %v200_v40  ;;  %v189_v62 = vld [vmem:[#allocation7 + $0x8] sm:$0xff]  ;;  %v188_v1 = vld [vmem:[#allocation7] sm:$0xff]  ;;  %v186_v3 = vld [vmem:[#allocation4] sm:$0xff] }
  0x49   :  { %129 = vmatprep.subr.mxu0 %v88_v41  ;;  %240 = vmatprep.subr.mxu1 %v199_v42  ;;  %v75_v2 = vld [vmem:[#allocation2] sm:$0xff]  ;;  %v76_v4 = vld [vmem:[#allocation2 + $0x8] sm:$0xff]  ;;  %v187_v5 = vld [vmem:[#allocation4 + $0x8] sm:$0xff] }
  0x4a   :  { %130 = vmatpush1.msra.mxu0 %v87_v43  ;;  %241 = vmatpush1.msra.mxu1 %v198_v44  ;;  %v339_v6 = vld [vmem:[%s523_s4] ss:$0 sm:$0xff]  ;;  %v340_v7 = vld [vmem:[%s523_s4 + $0x1] ss:$0 sm:$0xff] }
  0x4b   :  { %131 = vmatprep.subr.mxu0 %v86_v45  ;;  %242 = vmatprep.subr.mxu1 %v197_v46 }
  0x4c   :  { %132 = vmatpush1.msra.mxu0 %v85_v47  ;;  %243 = vmatpush1.msra.mxu1 %v196_v48 }
  0x4d   :  { %133 = vmatprep.subr.mxu0 %v84_v49  ;;  %244 = vmatprep.subr.mxu1 %v195_v50 }
  0x4e   :  { %134 = vmatpush1.msra.mxu0 %v83_v51  ;;  %245 = vmatpush1.msra.mxu1 %v194_v52 }
  0x4f   :  { %135 = vmatprep.subr.mxu0 %v82_v53  ;;  %246 = vmatprep.subr.mxu1 %v193_v54 }
  0x50   :  { %136 = vmatpush1.msra.mxu0 %v81_v55  ;;  %247 = vmatpush1.msra.mxu1 %v192_v56 }
  0x51   :  { %137 = vmatprep.subr.mxu0 %v80_v57  ;;  %248 = vmatprep.subr.mxu1 %v191_v58 }
  0x52   :  { %138 = vmatpush1.msra.mxu0 %v79_v59  ;;  %249 = vmatpush1.msra.mxu1 %v190_v60 }
  0x53   :  { %139 = vmatprep.subr.mxu0 %v78_v61  ;;  %250 = vmatprep.subr.mxu1 %v189_v62 }
  0x54   :  { %140 = vmatpush1.msra.mxu0 %v77_v63  ;;  %251 = vmatpush1.msra.mxu1 %v188_v1 }
  0x55   :  { %174 = vmatmul.mubr.f32.vlgmr.msra.gmra.mxu0 %v75_v2  ;;  %285 = vmatmul.mubr.f32.vlgmr.msra.gmra.mxu1 %v186_v3 }
  0x56   :  { %179 = vmatprep.mubr.f32.mxu0 %v445_v0  ;;  %290 = vmatprep.mubr.f32.mxu1 %v445_v0  ;;  %v341_v0 = vld [vmem:[%s523_s4 + $0x2] ss:$0 sm:$0xff] }
  0x59   :  { %180 = vmatmul.mubr.f32.gmra.mxu0 %v76_v4  ;;  %291 = vmatmul.mubr.f32.gmra.mxu1 %v187_v5 }
 0x115   :  { %v175_v8 = vpop.f32.mrf.mxu0  ;;  %v286_v9 = vpop.f32.mrf.mxu1 }
 0x116   :  { %v304_v10 = vadd.f32 %v339_v6, %v175_v8  ;;  %v315_v11 = vadd.f32 %v340_v7, %v286_v9 }
 0x117   :  { %v177_v12 = vpop.f32.mrf.mxu0  ;;  %v288_v13 = vpop.f32.mrf.mxu1 }
 0x118   :  { %306 = vst [vmem:[%s524_s5] sm:$0xff] %v304_v10  ;;  %317 = vst [vmem:[%s524_s5 + $0x8] sm:$0xff] %v315_v11  ;;  %v319_v14 = vadd.f32 %v288_v13, %v177_v12 }
 0x119   :  { %v181_v15 = vpop.f32.mrf.mxu0  ;;  %v292_v16 = vpop.f32.mrf.mxu1 }
 0x11a   :  { %v328_v17 = vadd.f32 %v341_v0, %v319_v14  ;;  %v305_v18 = vadd.f32 %v339_v6, %v181_v15  ;;  %v316_v19 = vadd.f32 %v340_v7, %v292_v16 }
 0x11b   :  { %v183_v20 = vpop.f32.mrf.mxu0  ;;  %v294_v21 = vpop.f32.mrf.mxu1 }
 0x11c   :  { %330 = vst [vmem:[%s524_s5 + $0x10] sm:$0xff] %v328_v17  ;;  %307 = vst [vmem:[%s524_s5 + $0x18] sm:$0xff] %v305_v18  ;;  %v320_v22 = vadd.f32 %v294_v21, %v183_v20 }
 0x11d   :  { %318 = vst [vmem:[%s524_s5 + $0x20] sm:$0xff] %v316_v19 }
 0x11e   :  { %v329_v23 = vadd.f32 %v341_v0, %v320_v22 }
 0x120   :  { %331 = vst [vmem:[%s524_s5 + $0x28] sm:$0xff] %v329_v23 }
 0x121   :  { %336 = vsyncpa [#allocation3], 1 }
 0x122   :  { %337 = vsyncpa [#allocation5], 1 }
 0x123   :  { %338 = vsyncpa [#allocation8], 1 }

</bundles_post_ra>
